<compile_context>
chip_gen: v7x
topology: tpu7x:2x2x1
jax: 0.10.0
libtpu: 0.0.40
codegen_flags: <defaults>
</compile_context>

<pallas_src>
import jax
import jax.numpy as jnp
from jax.experimental import pallas as pl
from jax.experimental.pallas import tpu as pltpu


_NEG_BIG = -1e30  # bias for padded logit lanes -> exp underflows to exactly 0


def attention_fusion_kernel(x_ref, wbd_ref, bcat_ref, wf_ref, bf_ref,
                            wo_ref, bo_ref, out_ref):
    """Whole forward pass for one batch tile.

    x_ref    : [TB, num*input]          batch-major concat of the num branch inputs
    wbd_ref  : [num*input, num*hidden]  block-diagonal branch weights
    bcat_ref : [1, num*hidden]          concatenated branch biases
    wf_ref   : [num*hidden, hidden]     fusion weights (attention scales pre-folded)
    bf_ref   : [1, hidden]
    wo_ref   : [hidden, padded_out]     output weights, lane-padded to 128
    bo_ref   : [1, padded_out]          output bias; padded lanes hold -1e30
    out_ref  : [TB, padded_out]
    """
    # One block-diagonal matmul == all per-branch matmuls + torch.cat(dim=1).
    concat = jnp.dot(x_ref[...], wbd_ref[...], preferred_element_type=jnp.float32)
    concat = jnp.maximum(concat + bcat_ref[...], 0.0)

    # fusion_linear + relu (attention scales already folded into wf rows; exact since
    # the scale is applied after the relu in the original module).
    fused = jnp.dot(concat, wf_ref[...], preferred_element_type=jnp.float32) + bf_ref[...]
    fused = jnp.maximum(fused, 0.0)
    # dropout(rate=0) -> identity

    # output_linear + softmax(dim=1). Padded lanes: logits = -1e30 -> exp -> 0.
    logits = jnp.dot(fused, wo_ref[...], preferred_element_type=jnp.float32) + bo_ref[...]
    m = jnp.max(logits, axis=1, keepdims=True)
    e = jnp.exp(logits - m)
    out_ref[...] = (e / jnp.sum(e, axis=1, keepdims=True)).astype(out_ref.dtype)


def _round_up(x, m):
    return ((x + m - 1) // m) * m


def attention_fusion(x_stacked, aw, w_stacked, b_stacked, wf, bf, wo, bo,
                     *, max_tile_b=128):
    """x_stacked: [num, B, input]; aw: [1, num]; w_stacked: [num, input, hidden];
    b_stacked: [num, 1, hidden]; wf: [hidden*num, hidden]; bf: [1, hidden];
    wo: [hidden, output]; bo: [1, output]. Returns [B, output]."""
    num, B, input_size = x_stacked.shape
    hidden = w_stacked.shape[2]
    output_size = wo.shape[1]
    f32 = jnp.float32

    # ---- cheap parameter preprocessing (pure JAX, outside the kernel) ----
    # Block-diagonal branch weight: x2d @ wbd == cat_i(x_i @ W_i).
    wbd = jnp.einsum('ij,ipq->ipjq', jnp.eye(num, dtype=f32), w_stacked.astype(f32))
    wbd = wbd.reshape(num * input_size, num * hidden)
    bcat = b_stacked.astype(f32).reshape(1, num * hidden)

    # Fold attention scales into the fusion-weight row blocks (post-relu scale == row scale).
    scale = jnp.repeat(aw.astype(f32).reshape(num), hidden)          # [num*hidden]
    wf_scaled = wf.astype(f32) * scale[:, None]

    # Lane-dense output: pad logit/output lane dim to a multiple of 128.
    padded_out = max(128, _round_up(output_size, 128))
    wo_p = jnp.zeros((hidden, padded_out), f32).at[:, :output_size].set(wo.astype(f32))
    bo_p = jnp.full((1, padded_out), _NEG_BIG, f32).at[:, :output_size].set(
        bo.astype(f32).reshape(1, output_size))

    # Batch-major input slab: row b = [x_0[b] | x_1[b] | ... | x_{num-1}[b]].
    x2d = jnp.swapaxes(x_stacked.astype(f32), 0, 1).reshape(B, num * input_size)

    # Batch tiling: parallel grid over batch (lets v7x use both TensorCores).
    tile_b = max_tile_b if B >= max_tile_b else _round_up(B, 8)
    b_pad = _round_up(B, tile_b)
    if b_pad != B:
        x2d = jnp.pad(x2d, ((0, b_pad - B), (0, 0)))
    grid = (b_pad // tile_b,)

    # VMEM budget from actual block sizes (double-buffered), with headroom;
    # keeps this pattern honest w.r.t. v7x's 64 MiB VMEM.
    block_shapes = [
        (tile_b, num * input_size), (num * input_size, num * hidden),
        (1, num * hidden), (num * hidden, hidden), (1, hidden),
        (hidden, padded_out), (1, padded_out), (tile_b, padded_out),
    ]
    vmem_bytes = sum(2 * 4 * s0 * s1 for (s0, s1) in block_shapes)
    vmem_limit = int(min(max(4 * vmem_bytes, 8 * 1024 * 1024), 64 * 1024 * 1024))

    out_padded = pl.pallas_call(
        attention_fusion_kernel,
        out_shape=jax.ShapeDtypeStruct((b_pad, padded_out), f32),
        grid=grid,
        in_specs=[
            pl.BlockSpec((tile_b, num * input_size), lambda i: (i, 0)),      # x tile
            pl.BlockSpec((num * input_size, num * hidden), lambda i: (0, 0)),  # Wbd (resident)
            pl.BlockSpec((1, num * hidden), lambda i: (0, 0)),               # bcat
            pl.BlockSpec((num * hidden, hidden), lambda i: (0, 0)),          # wf (scaled)
            pl.BlockSpec((1, hidden), lambda i: (0, 0)),                     # bf
            pl.BlockSpec((hidden, padded_out), lambda i: (0, 0)),            # wo (padded)
            pl.BlockSpec((1, padded_out), lambda i: (0, 0)),                 # bo (padded)
        ],
        out_specs=pl.BlockSpec((tile_b, padded_out), lambda i: (i, 0)),
        compiler_params=pltpu.CompilerParams(
            dimension_semantics=("parallel",),
            vmem_limit_bytes=vmem_limit,
        ),
    )(x2d, wbd, bcat, wf_scaled, bf.astype(f32), wo_p, bo_p)

    # Strip batch and lane padding outside the kernel (cheap XLA slice).
    return out_padded[:B, :output_size]


def reference(x_stacked, aw, w_stacked, b_stacked, wf, bf, wo, bo):
    num = x_stacked.shape[0]
    hs = []
    for i in range(num):
        h = jax.nn.relu(x_stacked[i] @ w_stacked[i] + b_stacked[i])
        hs.append(h * aw[0, i])
    concat = jnp.concatenate(hs, axis=1)
    fused = jax.nn.relu(concat @ wf + bf)
    return jax.nn.softmax(fused @ wo + bo, axis=1)


if __name__ == "__main__":
    # Small shapes consistent with the module
    batch = 8
    input_size = 32
    hidden_size = 32
    num = 3
    output_size = 16

    key = jax.random.PRNGKey(0)
    keys = jax.random.split(key, 10)

    # Deterministic synthetic parameters (PyTorch-style uniform init, not a checkpoint).
    bound_in = 1.0 / jnp.sqrt(input_size)
    w_stacked = jax.random.uniform(keys[0], (num, input_size, hidden_size),
                                   jnp.float32, -bound_in, bound_in)
    b_stacked = jax.random.uniform(keys[1], (num, 1, hidden_size),
                                   jnp.float32, -bound_in, bound_in)
    aw = jax.random.uniform(keys[2], (1, num), jnp.float32)  # torch.rand(num)

    bound_f = 1.0 / jnp.sqrt(hidden_size * num)
    wf = jax.random.uniform(keys[3], (hidden_size * num, hidden_size),
                            jnp.float32, -bound_f, bound_f)
    bf = jax.random.uniform(keys[4], (1, hidden_size), jnp.float32, -bound_f, bound_f)

    bound_o = 1.0 / jnp.sqrt(hidden_size)
    wo = jax.random.uniform(keys[5], (hidden_size, output_size),
                            jnp.float32, -bound_o, bound_o)
    bo = jax.random.uniform(keys[6], (1, output_size), jnp.float32, -bound_o, bound_o)

    # Inputs: x_list of `num` tensors [batch, input_size], stacked along axis 0.
    x_stacked = jax.random.normal(keys[7], (num, batch, input_size), jnp.float32)

    out = attention_fusion(x_stacked, aw, w_stacked, b_stacked, wf, bf, wo, bo)
    out = jax.block_until_ready(out)

    ref = reference(x_stacked, aw, w_stacked, b_stacked, wf, bf, wo, bo)
    assert out.shape == (batch, output_size)
    assert jnp.allclose(out, ref, atol=1e-5, rtol=1e-4), "mismatch vs pure-JAX reference"

    print("KERNEL_OK")
</pallas_src>

<mosaic_0001>
module attributes {stable_mosaic.version = 11 : i64} {
  func.func @attention_fusion_kernel(%arg0: i32, %arg1: memref<8x96xf32, #tpu.memory_space<vmem>>, %arg2: memref<96x96xf32, #tpu.memory_space<vmem>>, %arg3: memref<1x96xf32, #tpu.memory_space<vmem>>, %arg4: memref<96x32xf32, #tpu.memory_space<vmem>>, %arg5: memref<1x32xf32, #tpu.memory_space<vmem>>, %arg6: memref<32x128xf32, #tpu.memory_space<vmem>>, %arg7: memref<1x128xf32, #tpu.memory_space<vmem>>, %arg8: memref<8x128xf32, #tpu.memory_space<vmem>>) attributes {dimension_semantics = [#tpu.dimension_semantics<parallel>], iteration_bounds = array<i64: 1>, scalar_prefetch = 0 : i64, scratch_operands = 0 : i64, tpu.core_type = #tpu.core_type<tc>, window_params = [{transform_indices = @transform_0, window_bounds = array<i64: 8, 96>}, {pipeline_mode = #tpu.pipeline_mode<synchronous>, transform_indices = @transform_1, window_bounds = array<i64: 96, 96>}, {pipeline_mode = #tpu.pipeline_mode<synchronous>, transform_indices = @transform_2, window_bounds = array<i64: 1, 96>}, {pipeline_mode = #tpu.pipeline_mode<synchronous>, transform_indices = @transform_3, window_bounds = array<i64: 96, 32>}, {pipeline_mode = #tpu.pipeline_mode<synchronous>, transform_indices = @transform_4, window_bounds = array<i64: 1, 32>}, {pipeline_mode = #tpu.pipeline_mode<synchronous>, transform_indices = @transform_5, window_bounds = array<i64: 32, 128>}, {pipeline_mode = #tpu.pipeline_mode<synchronous>, transform_indices = @transform_6, window_bounds = array<i64: 1, 128>}, {transform_indices = @transform_7, window_bounds = array<i64: 8, 128>}]} {
    %c0 = arith.constant 0 : index
    %c0_0 = arith.constant 0 : index
    %0 = vector.load %arg1[%c0, %c0_0] : memref<8x96xf32, #tpu.memory_space<vmem>>, vector<8x96xf32>
    %c0_1 = arith.constant 0 : index
    %c0_2 = arith.constant 0 : index
    %1 = vector.load %arg2[%c0_1, %c0_2] : memref<96x96xf32, #tpu.memory_space<vmem>>, vector<96x96xf32>
    %cst = arith.constant dense<0.000000e+00> : vector<8x96xf32>
    %2 = tpu.matmul %0, %1, %cst {dimension_numbers = #tpu.dot_dimension_numbers<[1], [0], [0], [1], [0, 0, 1, 1], [], []>} : vector<8x96xf32>, vector<96x96xf32>, vector<8x96xf32> -> vector<8x96xf32>
    %c0_3 = arith.constant 0 : index
    %c0_4 = arith.constant 0 : index
    %3 = vector.load %arg3[%c0_3, %c0_4] : memref<1x96xf32, #tpu.memory_space<vmem>>, vector<1x96xf32>
    %4 = vector.broadcast %3 : vector<1x96xf32> to vector<8x96xf32>
    %5 = arith.addf %2, %4 : vector<8x96xf32>
    %cst_5 = arith.constant 0.000000e+00 : f32
    %6 = vector.broadcast %cst_5 : f32 to vector<8x96xf32>
    %7 = arith.maximumf %5, %6 : vector<8x96xf32>
    %c0_6 = arith.constant 0 : index
    %c0_7 = arith.constant 0 : index
    %8 = vector.load %arg4[%c0_6, %c0_7] : memref<96x32xf32, #tpu.memory_space<vmem>>, vector<96x32xf32>
    %cst_8 = arith.constant dense<0.000000e+00> : vector<8x32xf32>
    %9 = tpu.matmul %7, %8, %cst_8 {dimension_numbers = #tpu.dot_dimension_numbers<[1], [0], [0], [1], [0, 0, 1, 1], [], []>} : vector<8x96xf32>, vector<96x32xf32>, vector<8x32xf32> -> vector<8x32xf32>
    %c0_9 = arith.constant 0 : index
    %c0_10 = arith.constant 0 : index
    %10 = vector.load %arg5[%c0_9, %c0_10] : memref<1x32xf32, #tpu.memory_space<vmem>>, vector<1x32xf32>
    %11 = vector.broadcast %10 : vector<1x32xf32> to vector<8x32xf32>
    %12 = arith.addf %9, %11 : vector<8x32xf32>
    %cst_11 = arith.constant 0.000000e+00 : f32
    %13 = vector.broadcast %cst_11 : f32 to vector<8x32xf32>
    %14 = arith.maximumf %12, %13 : vector<8x32xf32>
    %c0_12 = arith.constant 0 : index
    %c0_13 = arith.constant 0 : index
    %15 = vector.load %arg6[%c0_12, %c0_13] : memref<32x128xf32, #tpu.memory_space<vmem>>, vector<32x128xf32>
    %cst_14 = arith.constant dense<0.000000e+00> : vector<8x128xf32>
    %16 = tpu.matmul %14, %15, %cst_14 {dimension_numbers = #tpu.dot_dimension_numbers<[1], [0], [0], [1], [0, 0, 1, 1], [], []>} : vector<8x32xf32>, vector<32x128xf32>, vector<8x128xf32> -> vector<8x128xf32>
    %c0_15 = arith.constant 0 : index
    %c0_16 = arith.constant 0 : index
    %17 = vector.load %arg7[%c0_15, %c0_16] : memref<1x128xf32, #tpu.memory_space<vmem>>, vector<1x128xf32>
    %18 = vector.broadcast %17 : vector<1x128xf32> to vector<8x128xf32>
    %19 = arith.addf %16, %18 : vector<8x128xf32>
    %cst_17 = arith.constant dense<0xFF800000> : vector<8xf32>
    %20 = vector.multi_reduction <maximumf>, %19, %cst_17 [1] : vector<8x128xf32> to vector<8xf32>
    %21 = vector.shape_cast %20 : vector<8xf32> to vector<8x1xf32>
    %22 = vector.broadcast %21 : vector<8x1xf32> to vector<8x128xf32>
    %23 = arith.subf %19, %22 : vector<8x128xf32>
    %24 = math.exp %23 : vector<8x128xf32>
    %cst_18 = arith.constant dense<0.000000e+00> : vector<8xf32>
    %25 = vector.multi_reduction <add>, %24, %cst_18 [1] : vector<8x128xf32> to vector<8xf32>
    %26 = vector.shape_cast %25 : vector<8xf32> to vector<8x1xf32>
    %27 = vector.broadcast %26 : vector<8x1xf32> to vector<8x128xf32>
    %28 = arith.divf %24, %27 : vector<8x128xf32>
    %c0_19 = arith.constant 0 : index
    %c0_20 = arith.constant 0 : index
    %29 = vector.load %arg8[%c0_19, %c0_20] : memref<8x128xf32, #tpu.memory_space<vmem>>, vector<8x128xf32>
    tpu.vector_store %arg8[%c0_19, %c0_20], %28 {strides = array<i32>} : memref<8x128xf32, #tpu.memory_space<vmem>>, vector<8x128xf32>,
    return
  }
  func.func @transform_0(%arg0: i32) -> (i32, i32) {
    %c0_i32 = arith.constant 0 : i32
    %c0_i32_0 = arith.constant 0 : i32
    return %arg0, %c0_i32 : i32, i32
  }
  func.func @transform_1(%arg0: i32) -> (i32, i32) {
    %c0_i32 = arith.constant 0 : i32
    %c0_i32_0 = arith.constant 0 : i32
    %c0_i32_1 = arith.constant 0 : i32
    return %c0_i32, %c0_i32_0 : i32, i32
  }
  func.func @transform_2(%arg0: i32) -> (i32, i32) {
    %c0_i32 = arith.constant 0 : i32
    %c0_i32_0 = arith.constant 0 : i32
    %c0_i32_1 = arith.constant 0 : i32
    return %c0_i32, %c0_i32_0 : i32, i32
  }
  func.func @transform_3(%arg0: i32) -> (i32, i32) {
    %c0_i32 = arith.constant 0 : i32
    %c0_i32_0 = arith.constant 0 : i32
    %c0_i32_1 = arith.constant 0 : i32
    return %c0_i32, %c0_i32_0 : i32, i32
  }
  func.func @transform_4(%arg0: i32) -> (i32, i32) {
    %c0_i32 = arith.constant 0 : i32
    %c0_i32_0 = arith.constant 0 : i32
    %c0_i32_1 = arith.constant 0 : i32
    return %c0_i32, %c0_i32_0 : i32, i32
  }
  func.func @transform_5(%arg0: i32) -> (i32, i32) {
    %c0_i32 = arith.constant 0 : i32
    %c0_i32_0 = arith.constant 0 : i32
    %c0_i32_1 = arith.constant 0 : i32
    return %c0_i32, %c0_i32_0 : i32, i32
  }
  func.func @transform_6(%arg0: i32) -> (i32, i32) {
    %c0_i32 = arith.constant 0 : i32
    %c0_i32_0 = arith.constant 0 : i32
    %c0_i32_1 = arith.constant 0 : i32
    return %c0_i32, %c0_i32_0 : i32, i32
  }
  func.func @transform_7(%arg0: i32) -> (i32, i32) {
    %c0_i32 = arith.constant 0 : i32
    %c0_i32_0 = arith.constant 0 : i32
    return %arg0, %c0_i32 : i32, i32
  }
}

</mosaic_0001>

<bundles_post_ra>
// kernel: tpu_custom_call.1
= control target key start
LH: loop header
LB: loop body
LE: loop exit
PB: predicated region body
PF: predicated region fallthrough
CT: control target
= control target key end

     0   :  { %12 = vsyncpa [#allocation3], 0  ;;  %s719_s0 = inlined_call_operand.hbm [shape: f32[8,96], index: 0, kind: input, shape index: {}]   ;;  %s720_s1 = inlined_call_operand.vmem [shape: f32[96,96], index: 1, kind: input, shape index: {}]   ;;  %s721_s2 = inlined_call_operand.vmem [shape: f32[1,96], index: 2, kind: input, shape index: {}]   ;;  %s722_s3 = inlined_call_operand.vmem [shape: f32[96,32], index: 3, kind: input, shape index: {}]   ;;  %s723_s4 = inlined_call_operand.vmem [shape: f32[1,32], index: 4, kind: input, shape index: {}]   ;;  %s724_s5 = inlined_call_operand.vmem [shape: f32[32,128], index: 5, kind: input, shape index: {}]   ;;  %s725_s6 = inlined_call_operand.vmem [shape: f32[1,128], index: 6, kind: input, shape index: {}]   ;;  %s726_s7 = inlined_call_operand.hbm [shape: f32[8,128], index: 7, kind: output, shape index: {}]  }
   0x1   :  { %13 = vsyncpa [#allocation4], 0  ;;  %s538_s24 = smov [#allocation2]   ;;  %s490_s28 = scalar_lea.hbm %s719_s0, 128 }
   0x2   :  { %s20_s25 = sshll.u32 %s538_s24, 4  ;;  %p491_p0 = scmp.ne.s32.totalorder %s719_s0, %s490_s28  ;;  %s21_s25 = int_to_ptr.vmem [resolvable:$true] %s20_s25 }
   0x3   :  { %p494_p1 = scmp.lt.u32.totalorder %s490_s28, %s719_s0 }
   0x5   :  { %p496_p2 = pnand %p494_p1, %p491_p0 }
   0x7   :  { %499 = shalt.err (!%p496_p2)
}
   0x8   :  { %s500_s10 = scalar_lea.vmem %s21_s25, 128  ;;  %p505_p4 = scmp.lt.s32.totalorder %s21_s25, %s21_s25 }
   0x9   :  { %p501_p3 = scmp.ne.s32.totalorder %s21_s25, %s500_s10  ;;  %p506_p5 = scmp.lt.s32.totalorder %s500_s10, %s500_s10 }
   0xb   :  { %p507_p6 = por %p506_p5, %p505_p4 }
   0xd   :  { %p508_p7 = pnand %p507_p6, %p501_p3 }
   0xf   :  { %511 = shalt.err (!%p508_p7)
}
  0x10   :  { %23 = dma.hbm_to_vmem [thread:$0]  %s719_s0, 128, %s21_s25, [#allocation3]  }
  0x11   :  { %534 = dma.done.wait [#allocation3], 128  }
  0x12   :  { %535 = vsyncadd [#allocation3], 4294967168  ;;  %v539_v0 = vmov 0.0|0.0   ;;  %vm540_vm0 = vmmov 0   ;;  %v541_v1 = vmov 0.0   ;;  %v40_v2 = vld [vmem:[%s720_s1] sm:$0xff] }
  0x13   :  { %439 = vmatprep.subr.bf16.mxu0 %v539_v0  ;;  %398 = vmatprep.mubr.msk.f32.mxu0 %vm540_vm0, %v541_v1  ;;  %v41_v3 = vld [vmem:[%s720_s1 + $0x8] sm:$0xff]  ;;  %v42_v4 = vld [vmem:[%s720_s1 + $0x10] sm:$0xff]  ;;  %v43_v6 = vld [vmem:[%s720_s1 + $0x18] sm:$0xff]  ;;  %vm59_vm1 = vcmask 785408   ;;  %vm238_vm2 = vcmask 261120  }
  0x14   :  { %457 = vmatprep.subr.bf16.mxu1 %v539_v0  ;;  %425 = vmatprep.mubr.msk.f32.mxu1 %vm540_vm0, %v541_v1  ;;  %v440_v5 = vpack.c.bf16 %v41_v3, %v40_v2  ;;  %v443_v7 = vpack.c.bf16 %v43_v6, %v42_v4  ;;  %v44_v8 = vld [vmem:[%s720_s1 + $0x20] sm:$0xff]  ;;  %v45_v9 = vld [vmem:[%s720_s1 + $0x28] sm:$0xff]  ;;  %v136_v13 = vld [vmem:[%s722_s3 + $0x10] sm:$0xff] }
  0x15   :  { %v134_v10 = vld [vmem:[%s722_s3] sm:$0xff]  ;;  %v135_v11 = vld [vmem:[%s722_s3 + $0x8] sm:$0xff]  ;;  %v137_v14 = vld [vmem:[%s722_s3 + $0x18] sm:$0xff]  ;;  %v446_v15 = vpack.c.bf16 %v45_v9, %v44_v8 }
  0x16   :  { %441 = vmatpush3.bf16.msra.mxu0 %v440_v5  ;;  %v458_v12 = vpack.c.bf16 %v135_v11, %v134_v10  ;;  %v46_v16 = vld [vmem:[%s720_s1 + $0x30] sm:$0xff]  ;;  %v461_v17 = vpack.c.bf16 %v137_v14, %v136_v13  ;;  %v47_v18 = vld [vmem:[%s720_s1 + $0x38] sm:$0xff]  ;;  %v138_v19 = vld [vmem:[%s722_s3 + $0x20] sm:$0xff] }
  0x17   :  { %442 = vmatprep.subr.bf16.mxu0 %v539_v0  ;;  %v139_v20 = vld [vmem:[%s722_s3 + $0x28] sm:$0xff]  ;;  %v449_v21 = vpack.c.bf16 %v47_v18, %v46_v16  ;;  %v48_v22 = vld [vmem:[%s720_s1 + $0x40] sm:$0xff]  ;;  %v140_v25 = vld [vmem:[%s722_s3 + $0x30] sm:$0xff] }
  0x18   :  { %459 = vmatpush3.bf16.msra.mxu1 %v458_v12  ;;  %v464_v23 = vpack.c.bf16 %v139_v20, %v138_v19  ;;  %v49_v24 = vld [vmem:[%s720_s1 + $0x48] sm:$0xff]  ;;  %v141_v26 = vld [vmem:[%s722_s3 + $0x38] sm:$0xff]  ;;  %v50_v28 = vld [vmem:[%s720_s1 + $0x50] sm:$0xff] }
  0x19   :  { %460 = vmatprep.subr.bf16.mxu1 %v539_v0  ;;  %v452_v27 = vpack.c.bf16 %v49_v24, %v48_v22  ;;  %v467_v29 = vpack.c.bf16 %v141_v26, %v140_v25  ;;  %v51_v30 = vld [vmem:[%s720_s1 + $0x58] sm:$0xff]  ;;  %v142_v31 = vld [vmem:[%s722_s3 + $0x40] sm:$0xff]  ;;  %v143_v32 = vld [vmem:[%s722_s3 + $0x48] sm:$0xff] }
  0x1a   :  { %444 = vmatpush3.bf16.msra.mxu0 %v443_v7  ;;  %v455_v33 = vpack.c.bf16 %v51_v30, %v50_v28  ;;  %v470_v34 = vpack.c.bf16 %v143_v32, %v142_v31  ;;  %v39_v35 = vld [vmem:[#allocation2] sm:$0xff]  ;;  %v144_v36 = vld [vmem:[%s722_s3 + $0x50] sm:$0xff]  ;;  %v145_v37 = vld [vmem:[%s722_s3 + $0x58] sm:$0xff] }
  0x1b   :  { %445 = vmatprep.subr.bf16.mxu0 %v539_v0  ;;  %v473_v38 = vpack.c.bf16 %v145_v37, %v144_v36  ;;  %v227_v39 = vld [vmem:[%s724_s5] sm:$0xff]  ;;  %v228_v40 = vld [vmem:[%s724_s5 + $0x8] sm:$0xff]  ;;  %v229_v47 = vld [vmem:[%s724_s5 + $0x10] sm:$0xff] }
  0x1c   :  { %462 = vmatpush3.bf16.msra.mxu1 %v461_v17  ;;  %v476_v41 = vpack.c.bf16 %v228_v40, %v227_v39  ;;  %v337_v42 = vld [vmem:[%s721_s2] ss:$0 sm:$0xff]  ;;  %v230_v48 = vld [vmem:[%s724_s5 + $0x18] sm:$0xff] }
  0x1d   :  { %463 = vmatprep.subr.bf16.mxu1 %v539_v0  ;;  %v479_v49 = vpack.c.bf16 %v230_v48, %v229_v47  ;;  %v339_v50 = vld [vmem:[%s723_s4] ss:$0 sm:$0xff]  ;;  %s542_s4 = smov [#allocation5]  }
  0x1e   :  { %447 = vmatpush3.bf16.msra.mxu0 %v446_v15  ;;  %v341_v55 = vld [vmem:[%s725_s6] ss:$0 sm:$0xff]  ;;  %s328_s5 = sshll.u32 %s542_s4, 4  ;;  %s329_s5 = int_to_ptr.vmem [resolvable:$true] %s328_s5 }
  0x1f   :  { %448 = vmatprep.subr.bf16.mxu0 %v539_v0  ;;  %s512_s23 = scalar_lea.vmem %s329_s5, 128  ;;  %p517_p9 = scmp.lt.s32.totalorder %s329_s5, %s329_s5 }
  0x20   :  { %465 = vmatpush3.bf16.msra.mxu1 %v464_v23  ;;  %p513_p8 = scmp.ne.s32.totalorder %s329_s5, %s512_s23  ;;  %p518_p10 = scmp.lt.s32.totalorder %s512_s23, %s512_s23 }
  0x21   :  { %466 = vmatprep.subr.bf16.mxu1 %v539_v0 }
  0x22   :  { %450 = vmatpush3.bf16.msra.mxu0 %v449_v21  ;;  %p519_p11 = por %p518_p10, %p517_p9 }
  0x23   :  { %451 = vmatprep.subr.bf16.mxu0 %v539_v0 }
  0x24   :  { %468 = vmatpush3.bf16.msra.mxu1 %v467_v29  ;;  %p520_p12 = pnand %p519_p11, %p513_p8 }
  0x25   :  { %469 = vmatprep.subr.bf16.mxu1 %v539_v0 }
  0x26   :  { %453 = vmatpush3.bf16.msra.mxu0 %v452_v27 }
  0x27   :  { %454 = vmatprep.subr.bf16.mxu0 %v539_v0 }
  0x28   :  { %471 = vmatpush3.bf16.msra.mxu1 %v470_v34 }
  0x29   :  { %472 = vmatprep.subr.bf16.mxu1 %v539_v0 }
  0x2a   :  { %456 = vmatpush3.bf16.msra.mxu0 %v455_v33 }
  0x2b   :  { %475 = vmatprep.subr.bf16.mxu0 %v539_v0 }
  0x2c   :  { %474 = vmatpush3.bf16.msra.mxu1 %v473_v38 }
  0x2d   :  { %399 = vmatmul.mubr.msk.f32.vlgmr.msra.gmra.mrb[0].mxu0 %vm59_vm1, %v39_v35 }
  0x2e   :  { %436 = vmatprep.mubr.msk.f32.mxu0 %vm540_vm0, %v541_v1  ;;  %477 = vmatpush3.bf16.msra.mxu0 %v476_v41 }
  0x2f   :  { %478 = vmatprep.subr.bf16.mxu0 %v539_v0 }
  0x32   :  { %480 = vmatpush3.bf16.msra.mxu0 %v479_v49 }
 0x100   :  { %v129_v43 = vpop.f32.mrb[0].mxu0 }
 0x101   :  { %v130_v44 = vadd.f32 %v337_v42, %v129_v43  ;;  %v400_v45 = vpop.f32.mrb[1].mxu0 }
 0x103   :  { %v133_v46 = vmax.f32 %v130_v44, 0.0 }
 0x105   :  { %426 = vmatmul.mubr.msk.f32.vlgmr.msra.gmra.mrb[0].mxu1 %vm59_vm1, %v133_v46 }
 0x1d8   :  { %v222_v51 = vpop.f32.mrb[0].mxu1 }
 0x1d9   :  { %v223_v52 = vadd.f32 %v339_v50, %v222_v51  ;;  %v427_v53 = vpop.f32.mrb[1].mxu1 }
 0x1db   :  { %v226_v54 = vmax.f32 %v223_v52, 0.0 }
 0x1dd   :  { %437 = vmatmul.mubr.msk.f32.vlgmr.msra.gmra.mrb[2].mxu0 %vm238_vm2, %v226_v54 }
 0x2b0   :  { %v308_v56 = vpop.f32.mrb[2].mxu0 }
 0x2b1   :  { %v309_v57 = vadd.f32 %v341_v55, %v308_v56  ;;  %v438_v58 = vpop.f32.mrb[3].mxu0 }
 0x2b3   :  { %312 = vmax.xlane.f32.xlu0 %v309_v57 }
 0x340   :  { %v313_v59 = vpop.xlane.xlu0 %312 }
 0x341   :  { %v314_v60 = vsub.f32 %v309_v57, %v313_v59 }
 0x343   :  { %v315_v61 = vmul.f32 1.442695, %v314_v60 }
 0x345   :  { %486 = vpow2.f32 %v315_v61 }
 0x34f   :  { %v487_v62 = vpop.eup %486 }
 0x350   :  { %317 = vadd.xlane.f32.xlu0 %v487_v62 }
 0x3dd   :  { %v318_v63 = vpop.xlane.xlu0 %317 }
 0x3de   :  { %488 = vrcp.f32 %v318_v63 }
 0x3e8   :  { %v489_v0 = vpop.eup %488 }
 0x3e9   :  { %v320_v1 = vmul.f32 %v489_v0, %v487_v62 }
 0x3eb   :  { %321 = vst [vmem:[#allocation5] sm:$0xff] %v320_v1 }
 0x3ec   :  { %523 = shalt.err (!%p520_p12)
}
 0x3ed   :  { %s524_s25 = scalar_lea.hbm %s726_s7, 128 }
 0x3ee   :  { %p525_p13 = scmp.ne.s32.totalorder %s726_s7, %s524_s25  ;;  %p528_p0 = scmp.lt.u32.totalorder %s524_s25, %s726_s7 }
 0x3f0   :  { %p530_p1 = pnand %p528_p0, %p525_p13 }
 0x3f2   :  { %533 = shalt.err (!%p530_p1)
}
 0x3f3   :  { %331 = dma.vmem_to_hbm [thread:$0]  %s329_s5, 128, %s726_s7, [#allocation4]  }
 0x3f4   :  { %536 = dma.done.wait [#allocation4], 128  }
 0x3f5   :  { %537 = vsyncadd [#allocation4], 4294967168 }
 0x3f6   :  { %335 = vsyncpa [#allocation3], 1 }
 0x3f7   :  { %336 = vsyncpa [#allocation4], 1 }

</bundles_post_ra>
